<compile_context>
chip_gen: v7x
topology: tpu7x:2x2x1
jax: 0.10.0
libtpu: 0.0.40
codegen_flags: <defaults>
</compile_context>

<pallas_src>
import math
from functools import partial

import jax
import jax.numpy as jnp
from jax import lax
from jax.experimental import pallas as pl
from jax.experimental.pallas import tpu as pltpu

STAGE_NUM = 3
BN_EPS = 1e-5


def _emau_kernel(x_ref, mu0_ref, w1_ref, b1_ref, w2_ref, shift_ref,
                 out_ref, mu_out_ref):
    # x_ref      : (B_BLK, C, N) f32   input feature slab(s)
    # mu0_ref    : (1, C, K)     f32   initial bases (shared across batch)
    # w1_ref     : (C, C)        bf16  conv1 1x1 weight
    # b1_ref     : (C, 1)        f32   conv1 bias
    # w2_ref     : (C, C)        bf16  conv2 1x1 weight with BN scale folded in
    # shift_ref  : (C, 1)        f32   folded BN shift
    # out_ref    : (B_BLK, C, N) f32   output feature slab(s)
    # mu_out_ref : (B_BLK, K, C) f32   final bases (lane-dense, C on lanes)
    b_blk = x_ref.shape[0]
    w1 = w1_ref[...]
    w2 = w2_ref[...]
    b1 = b1_ref[...]
    shift = shift_ref[...]
    mu0 = mu0_ref[0]                                            # (C, K) f32

    for bi in range(b_blk):                                     # static unroll
        x_in = x_ref[bi]                                        # (C, N) f32

        # conv1 (1x1 conv + bias) == left matmul over channels
        x1 = jnp.dot(w1, x_in.astype(jnp.bfloat16),
                     preferred_element_type=jnp.float32) + b1   # (C, N) f32
        x1_bf = x1.astype(jnp.bfloat16)                         # cast once

        mu = mu0
        z = None
        for _ in range(STAGE_NUM):                              # static unroll
            # E-step: z = mu^T x1 -> (K, N); softmax over the K (sublane) axis
            z = lax.dot_general(
                mu.astype(jnp.bfloat16), x1_bf,
                dimension_numbers=(((0,), (0,)), ((), ())),
                preferred_element_type=jnp.float32)             # (K, N) f32
            z = jnp.exp(z - jnp.max(z, axis=0, keepdims=True))
            z = z * pl.reciprocal(jnp.sum(z, axis=0, keepdims=True), approx=True)
            # normalize responsibilities over the spatial (N, lane) axis
            z_ = z * pl.reciprocal(1e-6 + jnp.sum(z, axis=1, keepdims=True),
                                   approx=True)
            # M-step: mu = x1 @ z_^T -> (C, K); L2-normalize over channels
            mu = lax.dot_general(
                x1_bf, z_.astype(jnp.bfloat16),
                dimension_numbers=(((1,), (1,)), ((), ())),
                preferred_element_type=jnp.float32)             # (C, K) f32
            mu = mu * lax.rsqrt(1e-6 + jnp.sum(mu * mu, axis=0, keepdims=True))

        # reconstruction: y = mu @ z -> (C, N), ReLU
        y = jnp.dot(mu.astype(jnp.bfloat16), z.astype(jnp.bfloat16),
                    preferred_element_type=jnp.float32)
        y = jnp.maximum(y, 0.0)

        # conv2 (no bias, BN scale folded into w2) + BN shift + residual + ReLU
        # TODO(synk): sync batch-norm training-mode batch statistics are not
        # computed in-kernel; inference running stats are folded instead.
        y2 = jnp.dot(w2, y.astype(jnp.bfloat16),
                     preferred_element_type=jnp.float32)
        y2 = y2 + shift + x_in
        out_ref[bi] = jnp.maximum(y2, 0.0)

        # store mu lane-dense as (K, C); wrapper transposes back to (C, K)
        mu_out_ref[bi] = mu.T


def _pick_b_blk(B, C, N):
    """Pick batch elements per grid step: enough work to amortize the ~0.35us
    per-step overhead, but keep >= 2 steps so both v7x TensorCores stay busy."""
    slab_bytes = C * N * 4
    blk = max(1, min(B, (256 * 1024) // max(slab_bytes, 1)))
    if B >= 2:
        blk = max(1, min(blk, B // 2))
    while B % blk:
        blk -= 1
    return blk


def _vmem_limit_bytes(b_blk, C, N, K):
    f32, bf16 = 4, 2
    io = 2 * 2 * (b_blk * C * N * f32)              # x + out, double-buffered
    io += 2 * (b_blk * K * C * f32)                 # mu out
    weights = 2 * C * C * bf16 + C * K * f32 + 4 * C * f32
    interm = b_blk * (2 * C * N * (f32 + bf16) + 2 * K * N * f32 + 2 * C * K * f32)
    est = io + weights + interm
    return int(min(64 * 1024 * 1024, max(32 * 1024 * 1024, 2 * est)))


def emau_forward(x_nchw, params, b_blk=None):
    """x_nchw: (B, C, H, W) float32.  Returns (out (B,C,H,W), mu (B,C,K))."""
    B, C, H, W = x_nchw.shape
    N = H * W
    K = params["mu"].shape[-1]
    x = x_nchw.reshape(B, C, N)

    # Fold inference BN into conv2 weight (scale) and an additive shift.
    scale = params["bn_gamma"] / jnp.sqrt(params["bn_var"] + BN_EPS)
    shift = (params["bn_beta"] - params["bn_mean"] * scale).reshape(C, 1)
    w1 = params["w1"].astype(jnp.bfloat16)
    w2f = (scale[:, None] * params["w2"]).astype(jnp.bfloat16)
    b1 = params["b1"].reshape(C, 1)

    if b_blk is None:
        b_blk = _pick_b_blk(B, C, N)
    assert B % b_blk == 0
    grid = (B // b_blk,)

    grid_spec = pltpu.PrefetchScalarGridSpec(
        num_scalar_prefetch=0,
        grid=grid,
        in_specs=[
            pl.BlockSpec((b_blk, C, N), lambda b: (b, 0, 0)),   # x
            pl.BlockSpec((1, C, K), lambda b: (0, 0, 0)),       # mu0 (shared)
            pl.BlockSpec((C, C), lambda b: (0, 0)),             # w1 (bf16)
            pl.BlockSpec((C, 1), lambda b: (0, 0)),             # b1
            pl.BlockSpec((C, C), lambda b: (0, 0)),             # w2 (BN folded)
            pl.BlockSpec((C, 1), lambda b: (0, 0)),             # bn shift
        ],
        out_specs=[
            pl.BlockSpec((b_blk, C, N), lambda b: (b, 0, 0)),   # out
            pl.BlockSpec((b_blk, K, C), lambda b: (b, 0, 0)),   # mu (K, C)
        ],
    )

    out, mu_kc = pl.pallas_call(
        _emau_kernel,
        out_shape=(
            jax.ShapeDtypeStruct((B, C, N), jnp.float32),
            jax.ShapeDtypeStruct((B, K, C), jnp.float32),
        ),
        grid_spec=grid_spec,
        compiler_params=pltpu.CompilerParams(
            dimension_semantics=("parallel",),
            vmem_limit_bytes=_vmem_limit_bytes(b_blk, C, N, K)),
    )(x, params["mu"], w1, b1, w2f, shift)

    mu = jnp.transpose(mu_kc, (0, 2, 1))   # back to (B, C, K)
    return out.reshape(B, C, H, W), mu


def emau_reference(x_nchw, params):
    """Pure-JAX f32 reference mirroring the PyTorch forward."""
    B, C, H, W = x_nchw.shape
    N = H * W
    x_in = x_nchw.reshape(B, C, N)
    w1, b1, w2 = params["w1"], params["b1"], params["w2"]
    scale = params["bn_gamma"] / jnp.sqrt(params["bn_var"] + BN_EPS)
    shift = params["bn_beta"] - params["bn_mean"] * scale

    x1 = jnp.einsum("oc,bcn->bon", w1, x_in) + b1[None, :, None]
    mu = jnp.broadcast_to(params["mu"], (B, C, params["mu"].shape[-1]))
    z = None
    for _ in range(STAGE_NUM):
        z = jnp.einsum("bcn,bck->bnk", x1, mu)
        z = jax.nn.softmax(z, axis=2)
        z_ = z / (1e-6 + jnp.sum(z, axis=1, keepdims=True))
        mu = jnp.einsum("bcn,bnk->bck", x1, z_)
        mu = mu / (1e-6 + jnp.linalg.norm(mu, axis=1, keepdims=True))
    y = jnp.einsum("bck,bnk->bcn", mu, z)
    y = jnp.maximum(y, 0.0)
    y2 = jnp.einsum("oc,bcn->bon", w2, y)
    y2 = y2 * scale[None, :, None] + shift[None, :, None]
    y2 = jnp.maximum(y2 + x_in, 0.0)
    return y2.reshape(B, C, H, W), mu


def make_params(key, c, k):
    k_mu, k_w1, k_b1, k_w2 = jax.random.split(key, 4)
    mu = jax.random.normal(k_mu, (1, c, k), jnp.float32) * math.sqrt(2.0 / k)
    mu = mu / (1e-6 + jnp.linalg.norm(mu, axis=1, keepdims=True))
    std = math.sqrt(2.0 / c)
    w1 = jax.random.normal(k_w1, (c, c), jnp.float32) * std
    b1 = jax.random.normal(k_b1, (c,), jnp.float32) * 0.01
    w2 = jax.random.normal(k_w2, (c, c), jnp.float32) * std
    return {
        "mu": mu, "w1": w1, "b1": b1, "w2": w2,
        "bn_gamma": jnp.ones((c,), jnp.float32),
        "bn_beta": jnp.zeros((c,), jnp.float32),
        "bn_mean": jnp.zeros((c,), jnp.float32),
        "bn_var": jnp.ones((c,), jnp.float32),
    }


if __name__ == "__main__":
    B, C, H, W, K = 2, 8, 16, 16, 8   # N = H*W = 256 (lane-aligned)
    key = jax.random.PRNGKey(0)
    k_x, k_p = jax.random.split(key)
    x = jax.random.normal(k_x, (B, C, H, W), jnp.float32)
    params = make_params(k_p, C, K)

    out, mu = emau_forward(x, params)
    out = jax.block_until_ready(out)
    mu = jax.block_until_ready(mu)

    ref_out, ref_mu = emau_reference(x, params)
    # bf16 matmuls + approx reciprocal/rsqrt perturb the EM iterates slightly;
    # tolerance relaxed accordingly.
    assert jnp.allclose(out, ref_out, atol=5e-2, rtol=5e-2), "output mismatch"
    assert jnp.allclose(mu, ref_mu, atol=5e-2, rtol=5e-2), "mu mismatch"
    print("KERNEL_OK")
</pallas_src>

<mosaic_0001>
module attributes {stable_mosaic.version = 11 : i64} {
  func.func @_emau_kernel(%arg0: i32, %arg1: memref<1x8x256xf32, #tpu.memory_space<vmem>>, %arg2: memref<1x8x8xf32, #tpu.memory_space<vmem>>, %arg3: memref<8x8xbf16, #tpu.memory_space<vmem>>, %arg4: memref<8x1xf32, #tpu.memory_space<vmem>>, %arg5: memref<8x8xbf16, #tpu.memory_space<vmem>>, %arg6: memref<8x1xf32, #tpu.memory_space<vmem>>, %arg7: memref<1x8x256xf32, #tpu.memory_space<vmem>>, %arg8: memref<1x8x8xf32, #tpu.memory_space<vmem>>) attributes {dimension_semantics = [#tpu.dimension_semantics<parallel>], iteration_bounds = array<i64: 2>, scalar_prefetch = 0 : i64, scratch_operands = 0 : i64, tpu.core_type = #tpu.core_type<tc>, window_params = [{transform_indices = @transform_0, window_bounds = array<i64: 1, 8, 256>}, {pipeline_mode = #tpu.pipeline_mode<synchronous>, transform_indices = @transform_1, window_bounds = array<i64: 1, 8, 8>}, {pipeline_mode = #tpu.pipeline_mode<synchronous>, transform_indices = @transform_2, window_bounds = array<i64: 8, 8>}, {pipeline_mode = #tpu.pipeline_mode<synchronous>, transform_indices = @transform_3, window_bounds = array<i64: 8, 1>}, {pipeline_mode = #tpu.pipeline_mode<synchronous>, transform_indices = @transform_4, window_bounds = array<i64: 8, 8>}, {pipeline_mode = #tpu.pipeline_mode<synchronous>, transform_indices = @transform_5, window_bounds = array<i64: 8, 1>}, {transform_indices = @transform_6, window_bounds = array<i64: 1, 8, 256>}, {transform_indices = @transform_7, window_bounds = array<i64: 1, 8, 8>}]} {
    %c0 = arith.constant 0 : index
    %c0_0 = arith.constant 0 : index
    %0 = vector.load %arg3[%c0, %c0_0] : memref<8x8xbf16, #tpu.memory_space<vmem>>, vector<8x8xbf16>
    %c0_1 = arith.constant 0 : index
    %c0_2 = arith.constant 0 : index
    %1 = vector.load %arg5[%c0_1, %c0_2] : memref<8x8xbf16, #tpu.memory_space<vmem>>, vector<8x8xbf16>
    %c0_3 = arith.constant 0 : index
    %c0_4 = arith.constant 0 : index
    %2 = vector.load %arg4[%c0_3, %c0_4] : memref<8x1xf32, #tpu.memory_space<vmem>>, vector<8x1xf32>
    %c0_5 = arith.constant 0 : index
    %c0_6 = arith.constant 0 : index
    %3 = vector.load %arg6[%c0_5, %c0_6] : memref<8x1xf32, #tpu.memory_space<vmem>>, vector<8x1xf32>
    %c0_7 = arith.constant 0 : index
    %c0_8 = arith.constant 0 : index
    %c0_9 = arith.constant 0 : index
    %4 = vector.load %arg2[%c0_7, %c0_8, %c0_9] : memref<1x8x8xf32, #tpu.memory_space<vmem>>, vector<1x8x8xf32>
    %5 = vector.shape_cast %4 : vector<1x8x8xf32> to vector<8x8xf32>
    %c0_10 = arith.constant 0 : index
    %c0_11 = arith.constant 0 : index
    %c0_12 = arith.constant 0 : index
    %6 = vector.load %arg1[%c0_10, %c0_11, %c0_12] : memref<1x8x256xf32, #tpu.memory_space<vmem>>, vector<1x8x256xf32>
    %7 = vector.shape_cast %6 : vector<1x8x256xf32> to vector<8x256xf32>
    %8 = arith.truncf %7 : vector<8x256xf32> to vector<8x256xbf16>
    %cst = arith.constant dense<0.000000e+00> : vector<8x256xf32>
    %9 = tpu.matmul %0, %8, %cst {dimension_numbers = #tpu.dot_dimension_numbers<[1], [0], [0], [1], [0, 0, 1, 1], [], []>} : vector<8x8xbf16>, vector<8x256xbf16>, vector<8x256xf32> -> vector<8x256xf32>
    %10 = vector.broadcast %2 : vector<8x1xf32> to vector<8x256xf32>
    %11 = arith.addf %9, %10 : vector<8x256xf32>
    %12 = arith.truncf %11 : vector<8x256xf32> to vector<8x256xbf16>
    %13 = arith.truncf %5 : vector<8x8xf32> to vector<8x8xbf16>
    %cst_13 = arith.constant dense<0.000000e+00> : vector<8x256xf32>
    %14 = tpu.matmul %13, %12, %cst_13 {dimension_numbers = #tpu.dot_dimension_numbers<[0], [0], [1], [1], [0, 1, 1, 1], [], []>} : vector<8x8xbf16>, vector<8x256xbf16>, vector<8x256xf32> -> vector<8x256xf32>
    %cst_14 = arith.constant dense<0xFF800000> : vector<256xf32>
    %15 = vector.multi_reduction <maximumf>, %14, %cst_14 [0] : vector<8x256xf32> to vector<256xf32>
    %16 = vector.shape_cast %15 : vector<256xf32> to vector<1x256xf32>
    %17 = vector.broadcast %16 : vector<1x256xf32> to vector<8x256xf32>
    %18 = arith.subf %14, %17 : vector<8x256xf32>
    %19 = math.exp %18 : vector<8x256xf32>
    %cst_15 = arith.constant dense<0.000000e+00> : vector<256xf32>
    %20 = vector.multi_reduction <add>, %19, %cst_15 [0] : vector<8x256xf32> to vector<256xf32>
    %21 = vector.shape_cast %20 : vector<256xf32> to vector<1x256xf32>
    %22 = tpu.reciprocal %21 {approx = true} : vector<1x256xf32> -> vector<1x256xf32>
    %23 = vector.broadcast %22 : vector<1x256xf32> to vector<8x256xf32>
    %24 = arith.mulf %19, %23 : vector<8x256xf32>
    %cst_16 = arith.constant dense<0.000000e+00> : vector<8xf32>
    %25 = vector.multi_reduction <add>, %24, %cst_16 [1] : vector<8x256xf32> to vector<8xf32>
    %26 = vector.shape_cast %25 : vector<8xf32> to vector<8x1xf32>
    %cst_17 = arith.constant 9.99999997E-7 : f32
    %27 = vector.broadcast %cst_17 : f32 to vector<8x1xf32>
    %28 = arith.addf %27, %26 : vector<8x1xf32>
    %29 = tpu.reciprocal %28 {approx = true} : vector<8x1xf32> -> vector<8x1xf32>
    %30 = vector.broadcast %29 : vector<8x1xf32> to vector<8x256xf32>
    %31 = arith.mulf %24, %30 : vector<8x256xf32>
    %32 = arith.truncf %31 : vector<8x256xf32> to vector<8x256xbf16>
    %cst_18 = arith.constant dense<0.000000e+00> : vector<8x8xf32>
    %33 = tpu.matmul %12, %32, %cst_18 {dimension_numbers = #tpu.dot_dimension_numbers<[1], [1], [0], [0], [0, 0, 1, 0], [], []>} : vector<8x256xbf16>, vector<8x256xbf16>, vector<8x8xf32> -> vector<8x8xf32>
    %34 = arith.mulf %33, %33 : vector<8x8xf32>
    %cst_19 = arith.constant dense<0.000000e+00> : vector<8xf32>
    %35 = vector.multi_reduction <add>, %34, %cst_19 [0] : vector<8x8xf32> to vector<8xf32>
    %36 = vector.shape_cast %35 : vector<8xf32> to vector<1x8xf32>
    %cst_20 = arith.constant 9.99999997E-7 : f32
    %37 = vector.broadcast %cst_20 : f32 to vector<1x8xf32>
    %38 = arith.addf %37, %36 : vector<1x8xf32>
    %39 = math.rsqrt %38 : vector<1x8xf32>
    %40 = vector.broadcast %39 : vector<1x8xf32> to vector<8x8xf32>
    %41 = arith.mulf %33, %40 : vector<8x8xf32>
    %42 = arith.truncf %41 : vector<8x8xf32> to vector<8x8xbf16>
    %cst_21 = arith.constant dense<0.000000e+00> : vector<8x256xf32>
    %43 = tpu.matmul %42, %12, %cst_21 {dimension_numbers = #tpu.dot_dimension_numbers<[0], [0], [1], [1], [0, 1, 1, 1], [], []>} : vector<8x8xbf16>, vector<8x256xbf16>, vector<8x256xf32> -> vector<8x256xf32>
    %cst_22 = arith.constant dense<0xFF800000> : vector<256xf32>
    %44 = vector.multi_reduction <maximumf>, %43, %cst_22 [0] : vector<8x256xf32> to vector<256xf32>
    %45 = vector.shape_cast %44 : vector<256xf32> to vector<1x256xf32>
    %46 = vector.broadcast %45 : vector<1x256xf32> to vector<8x256xf32>
    %47 = arith.subf %43, %46 : vector<8x256xf32>
    %48 = math.exp %47 : vector<8x256xf32>
    %cst_23 = arith.constant dense<0.000000e+00> : vector<256xf32>
    %49 = vector.multi_reduction <add>, %48, %cst_23 [0] : vector<8x256xf32> to vector<256xf32>
    %50 = vector.shape_cast %49 : vector<256xf32> to vector<1x256xf32>
    %51 = tpu.reciprocal %50 {approx = true} : vector<1x256xf32> -> vector<1x256xf32>
    %52 = vector.broadcast %51 : vector<1x256xf32> to vector<8x256xf32>
    %53 = arith.mulf %48, %52 : vector<8x256xf32>
    %cst_24 = arith.constant dense<0.000000e+00> : vector<8xf32>
    %54 = vector.multi_reduction <add>, %53, %cst_24 [1] : vector<8x256xf32> to vector<8xf32>
    %55 = vector.shape_cast %54 : vector<8xf32> to vector<8x1xf32>
    %cst_25 = arith.constant 9.99999997E-7 : f32
    %56 = vector.broadcast %cst_25 : f32 to vector<8x1xf32>
    %57 = arith.addf %56, %55 : vector<8x1xf32>
    %58 = tpu.reciprocal %57 {approx = true} : vector<8x1xf32> -> vector<8x1xf32>
    %59 = vector.broadcast %58 : vector<8x1xf32> to vector<8x256xf32>
    %60 = arith.mulf %53, %59 : vector<8x256xf32>
    %61 = arith.truncf %60 : vector<8x256xf32> to vector<8x256xbf16>
    %cst_26 = arith.constant dense<0.000000e+00> : vector<8x8xf32>
    %62 = tpu.matmul %12, %61, %cst_26 {dimension_numbers = #tpu.dot_dimension_numbers<[1], [1], [0], [0], [0, 0, 1, 0], [], []>} : vector<8x256xbf16>, vector<8x256xbf16>, vector<8x8xf32> -> vector<8x8xf32>
    %63 = arith.mulf %62, %62 : vector<8x8xf32>
    %cst_27 = arith.constant dense<0.000000e+00> : vector<8xf32>
    %64 = vector.multi_reduction <add>, %63, %cst_27 [0] : vector<8x8xf32> to vector<8xf32>
    %65 = vector.shape_cast %64 : vector<8xf32> to vector<1x8xf32>
    %cst_28 = arith.constant 9.99999997E-7 : f32
    %66 = vector.broadcast %cst_28 : f32 to vector<1x8xf32>
    %67 = arith.addf %66, %65 : vector<1x8xf32>
    %68 = math.rsqrt %67 : vector<1x8xf32>
    %69 = vector.broadcast %68 : vector<1x8xf32> to vector<8x8xf32>
    %70 = arith.mulf %62, %69 : vector<8x8xf32>
    %71 = arith.truncf %70 : vector<8x8xf32> to vector<8x8xbf16>
    %cst_29 = arith.constant dense<0.000000e+00> : vector<8x256xf32>
    %72 = tpu.matmul %71, %12, %cst_29 {dimension_numbers = #tpu.dot_dimension_numbers<[0], [0], [1], [1], [0, 1, 1, 1], [], []>} : vector<8x8xbf16>, vector<8x256xbf16>, vector<8x256xf32> -> vector<8x256xf32>
    %cst_30 = arith.constant dense<0xFF800000> : vector<256xf32>
    %73 = vector.multi_reduction <maximumf>, %72, %cst_30 [0] : vector<8x256xf32> to vector<256xf32>
    %74 = vector.shape_cast %73 : vector<256xf32> to vector<1x256xf32>
    %75 = vector.broadcast %74 : vector<1x256xf32> to vector<8x256xf32>
    %76 = arith.subf %72, %75 : vector<8x256xf32>
    %77 = math.exp %76 : vector<8x256xf32>
    %cst_31 = arith.constant dense<0.000000e+00> : vector<256xf32>
    %78 = vector.multi_reduction <add>, %77, %cst_31 [0] : vector<8x256xf32> to vector<256xf32>
    %79 = vector.shape_cast %78 : vector<256xf32> to vector<1x256xf32>
    %80 = tpu.reciprocal %79 {approx = true} : vector<1x256xf32> -> vector<1x256xf32>
    %81 = vector.broadcast %80 : vector<1x256xf32> to vector<8x256xf32>
    %82 = arith.mulf %77, %81 : vector<8x256xf32>
    %cst_32 = arith.constant dense<0.000000e+00> : vector<8xf32>
    %83 = vector.multi_reduction <add>, %82, %cst_32 [1] : vector<8x256xf32> to vector<8xf32>
    %84 = vector.shape_cast %83 : vector<8xf32> to vector<8x1xf32>
    %cst_33 = arith.constant 9.99999997E-7 : f32
    %85 = vector.broadcast %cst_33 : f32 to vector<8x1xf32>
    %86 = arith.addf %85, %84 : vector<8x1xf32>
    %87 = tpu.reciprocal %86 {approx = true} : vector<8x1xf32> -> vector<8x1xf32>
    %88 = vector.broadcast %87 : vector<8x1xf32> to vector<8x256xf32>
    %89 = arith.mulf %82, %88 : vector<8x256xf32>
    %90 = arith.truncf %89 : vector<8x256xf32> to vector<8x256xbf16>
    %cst_34 = arith.constant dense<0.000000e+00> : vector<8x8xf32>
    %91 = tpu.matmul %12, %90, %cst_34 {dimension_numbers = #tpu.dot_dimension_numbers<[1], [1], [0], [0], [0, 0, 1, 0], [], []>} : vector<8x256xbf16>, vector<8x256xbf16>, vector<8x8xf32> -> vector<8x8xf32>
    %92 = arith.mulf %91, %91 : vector<8x8xf32>
    %cst_35 = arith.constant dense<0.000000e+00> : vector<8xf32>
    %93 = vector.multi_reduction <add>, %92, %cst_35 [0] : vector<8x8xf32> to vector<8xf32>
    %94 = vector.shape_cast %93 : vector<8xf32> to vector<1x8xf32>
    %cst_36 = arith.constant 9.99999997E-7 : f32
    %95 = vector.broadcast %cst_36 : f32 to vector<1x8xf32>
    %96 = arith.addf %95, %94 : vector<1x8xf32>
    %97 = math.rsqrt %96 : vector<1x8xf32>
    %98 = vector.broadcast %97 : vector<1x8xf32> to vector<8x8xf32>
    %99 = arith.mulf %91, %98 : vector<8x8xf32>
    %100 = arith.truncf %99 : vector<8x8xf32> to vector<8x8xbf16>
    %101 = arith.truncf %82 : vector<8x256xf32> to vector<8x256xbf16>
    %cst_37 = arith.constant dense<0.000000e+00> : vector<8x256xf32>
    %102 = tpu.matmul %100, %101, %cst_37 {dimension_numbers = #tpu.dot_dimension_numbers<[1], [0], [0], [1], [0, 0, 1, 1], [], []>} : vector<8x8xbf16>, vector<8x256xbf16>, vector<8x256xf32> -> vector<8x256xf32>
    %cst_38 = arith.constant 0.000000e+00 : f32
    %103 = vector.broadcast %cst_38 : f32 to vector<8x256xf32>
    %104 = arith.maximumf %102, %103 : vector<8x256xf32>
    %105 = arith.truncf %104 : vector<8x256xf32> to vector<8x256xbf16>
    %cst_39 = arith.constant dense<0.000000e+00> : vector<8x256xf32>
    %106 = tpu.matmul %1, %105, %cst_39 {dimension_numbers = #tpu.dot_dimension_numbers<[1], [0], [0], [1], [0, 0, 1, 1], [], []>} : vector<8x8xbf16>, vector<8x256xbf16>, vector<8x256xf32> -> vector<8x256xf32>
    %107 = vector.broadcast %3 : vector<8x1xf32> to vector<8x256xf32>
    %108 = arith.addf %106, %107 : vector<8x256xf32>
    %109 = arith.addf %108, %7 : vector<8x256xf32>
    %cst_40 = arith.constant 0.000000e+00 : f32
    %110 = vector.broadcast %cst_40 : f32 to vector<8x256xf32>
    %111 = arith.maximumf %109, %110 : vector<8x256xf32>
    %c0_41 = arith.constant 0 : index
    %c0_42 = arith.constant 0 : index
    %c0_43 = arith.constant 0 : index
    %112 = vector.load %arg7[%c0_41, %c0_42, %c0_43] : memref<1x8x256xf32, #tpu.memory_space<vmem>>, vector<1x8x256xf32>
    %113 = vector.shape_cast %112 : vector<1x8x256xf32> to vector<8x256xf32>
    %114 = vector.shape_cast %111 : vector<8x256xf32> to vector<1x8x256xf32>
    tpu.vector_store %arg7[%c0_41, %c0_42, %c0_43], %114 {strides = array<i32>} : memref<1x8x256xf32, #tpu.memory_space<vmem>>, vector<1x8x256xf32>,
    %115 = tpu.transpose %99, [1, 0] : vector<8x8xf32> -> vector<8x8xf32>
    %c0_44 = arith.constant 0 : index
    %c0_45 = arith.constant 0 : index
    %c0_46 = arith.constant 0 : index
    %116 = vector.load %arg8[%c0_44, %c0_45, %c0_46] : memref<1x8x8xf32, #tpu.memory_space<vmem>>, vector<1x8x8xf32>
    %117 = vector.shape_cast %116 : vector<1x8x8xf32> to vector<8x8xf32>
    %118 = vector.shape_cast %115 : vector<8x8xf32> to vector<1x8x8xf32>
    tpu.vector_store %arg8[%c0_44, %c0_45, %c0_46], %118 {strides = array<i32>} : memref<1x8x8xf32, #tpu.memory_space<vmem>>, vector<1x8x8xf32>,
    return
  }
  func.func @transform_0(%arg0: i32) -> (i32, i32, i32) {
    %c0_i32 = arith.constant 0 : i32
    %c0_i32_0 = arith.constant 0 : i32
    %c0_i32_1 = arith.constant 0 : i32
    return %arg0, %c0_i32, %c0_i32_0 : i32, i32, i32
  }
  func.func @transform_1(%arg0: i32) -> (i32, i32, i32) {
    %c0_i32 = arith.constant 0 : i32
    %c0_i32_0 = arith.constant 0 : i32
    %c0_i32_1 = arith.constant 0 : i32
    %c0_i32_2 = arith.constant 0 : i32
    return %c0_i32, %c0_i32_0, %c0_i32_1 : i32, i32, i32
  }
  func.func @transform_2(%arg0: i32) -> (i32, i32) {
    %c0_i32 = arith.constant 0 : i32
    %c0_i32_0 = arith.constant 0 : i32
    %c0_i32_1 = arith.constant 0 : i32
    return %c0_i32, %c0_i32_0 : i32, i32
  }
  func.func @transform_3(%arg0: i32) -> (i32, i32) {
    %c0_i32 = arith.constant 0 : i32
    %c0_i32_0 = arith.constant 0 : i32
    %c0_i32_1 = arith.constant 0 : i32
    return %c0_i32, %c0_i32_0 : i32, i32
  }
  func.func @transform_4(%arg0: i32) -> (i32, i32) {
    %c0_i32 = arith.constant 0 : i32
    %c0_i32_0 = arith.constant 0 : i32
    %c0_i32_1 = arith.constant 0 : i32
    return %c0_i32, %c0_i32_0 : i32, i32
  }
  func.func @transform_5(%arg0: i32) -> (i32, i32) {
    %c0_i32 = arith.constant 0 : i32
    %c0_i32_0 = arith.constant 0 : i32
    %c0_i32_1 = arith.constant 0 : i32
    return %c0_i32, %c0_i32_0 : i32, i32
  }
  func.func @transform_6(%arg0: i32) -> (i32, i32, i32) {
    %c0_i32 = arith.constant 0 : i32
    %c0_i32_0 = arith.constant 0 : i32
    %c0_i32_1 = arith.constant 0 : i32
    return %arg0, %c0_i32, %c0_i32_0 : i32, i32, i32
  }
  func.func @transform_7(%arg0: i32) -> (i32, i32, i32) {
    %c0_i32 = arith.constant 0 : i32
    %c0_i32_0 = arith.constant 0 : i32
    %c0_i32_1 = arith.constant 0 : i32
    return %arg0, %c0_i32, %c0_i32_0 : i32, i32, i32
  }
}

</mosaic_0001>

<bundles_post_ra>
// kernel: tpu_custom_call.1
= control target key start
LH: loop header
LB: loop body
LE: loop exit
PB: predicated region body
PF: predicated region fallthrough
CT: control target
= control target key end

     0   :  { %13 = vsyncpa [#allocation3], 0  ;;  %s1690_s0 = inlined_call_operand.hbm [shape: f32[2,8,256], index: 0, kind: input, shape index: {}]   ;;  %s1691_s1 = inlined_call_operand.vmem [shape: f32[1,8,8], index: 1, kind: input, shape index: {}]   ;;  %s1692_s2 = inlined_call_operand.vmem [shape: bf16[8,8], index: 2, kind: input, shape index: {}]   ;;  %s1693_s3 = inlined_call_operand.vmem [shape: f32[8,1], index: 3, kind: input, shape index: {}]   ;;  %s1694_s4 = inlined_call_operand.vmem [shape: bf16[8,8], index: 4, kind: input, shape index: {}]   ;;  %s1695_s5 = inlined_call_operand.vmem [shape: f32[8,1], index: 5, kind: input, shape index: {}]   ;;  %s1696_s6 = inlined_call_operand.hbm [shape: f32[2,8,256], index: 6, kind: output, shape index: {0}]   ;;  %s1697_s7 = inlined_call_operand.hbm [shape: f32[2,8,8], index: 7, kind: output, shape index: {1}]  }
   0x1   :  { %15 = vsyncpa [#allocation3 + $0x1], 0 }
   0x2   :  { %16 = vsyncpa [#allocation4], 0 }
   0x3   :  { %18 = vsyncpa [#allocation4 + $0x1], 0 }
   0x4   :  { %19 = vsyncpa [#allocation7], 0 }
   0x5   :  { %21 = vsyncpa [#allocation7 + $0x1], 0  ;;  %s1428_s24 = smov 0   ;;  %s1430_s25 = smov 0  }
   0x6   :  { %s1432_s26 = smov 0   ;;  %s1434_s27 = smov 0  }
   0x7 LB: > { %s1449_s28 = sadd.s32 4294967295, %s1382_s27   ;;  %s1132_s29 = sadd.s32 4294967294, %s1382_s27   ;;  %s1382_s27 = sphi %s1434_s27, %s1712_s27   ;;  %s1378_s26 = sphi %s1432_s26, %s1711_s26   ;;  %s1374_s25 = sphi %s1430_s25, %s1710_s25   ;;  %s1370_s24 = sphi %s1428_s24, %s1709_s24  }
   0x8   : > { %s1453_s30 = sadd.s32 1, %s1382_s27   ;;  %s34_s8 = sadd.s32 1, %s1378_s26 }
   0x9   : > { %s31_s9 = ssub.s32 %s1382_s27, %s1453_s30  ;;  %p41_p0 = scmp.ne.s32.totalorder %s1378_s26, %s1374_s25 }
   0xa   : > { %p32_p1 = scmp.eq.s32.totalorder %s31_s9, 0  ;;  %p42_p2 = scmp.eq.s32.totalorder %s1382_s27, 0 }
   0xb   : > { %p47_p3 = scmp.ne.s32.totalorder %s1374_s25, %s1370_s24  ;;  %p48_p4 = scmp.eq.s32.totalorder %s1449_s28, 0 }
   0xc   : > { %s1465_s10 = scalar_select %p32_p1, %s1378_s26, %s34_s8  }
   0xd   : > { %p1467_p5 = por %p42_p2, %p41_p0  ;;  %p1471_p6 = por %p48_p4, %p47_p3 }
   0xe   : > { %p176_p7 = scmp.eq.s32.totalorder %s1449_s28, 1  ;;  %p182_p8 = scmp.eq.s32.totalorder %s1132_s29, 1 }
   0xf   : > { %p1180_p10 = scmp.lt.s32.totalorder %s1382_s27, 2  ;;  %s243_s15 = sand.u32 1, %s1378_s26  }
  0x10   : > { %p1478_p11 = por %p176_p7, %p41_p0  ;;  %p1482_p12 = por %p182_p8, %p47_p3 }
  0x11   : > { %s1161_s16 = sshll.u32 %s1382_s27, 8  ;;  %s1135_s17 = sshll.u32 %s243_s15, 4 }
  0x12   : > { %s1701_s13 = scalar_select %p1478_p11, 1, 0 }
  0x13   : > { %s1702_s14 = scalar_select %p1482_p12, 1, 0 }
  0x14   : > { %s1491_s20 = scalar_lea.hbm %s1690_s0, %s1161_s16  ;;  %s247_s21 = scalar_lea.vmem [#allocation2], %s1135_s17 }
  0x15   : > { %s255_s22 = sshll.u32 %s247_s21, 4  ;;  %p1495_p13 = pnand %p1180_p10, %p1467_p5  ;;  %s1499_s22 = int_to_ptr.vmem [resolvable:$true] %s255_s22 }
  0x16   : > { %s244_s29 = scalar_lea.sflag [#allocation3], %s243_s15  ;;  %s1254_s8 = scalar_lea.hbm %s1491_s20, 256 }
  0x17   : > { %p1255_p2 = scmp.ne.s32.totalorder %s1491_s20, %s1254_s8  ;;  %p1256_p3 = pneg %p1495_p13 }
  0x18   : > { %s1259_s16 = scalar_lea.hbm %s1690_s0, 512  ;;  %p1260_p5 = scmp.lt.u32.totalorder %s1491_s20, %s1690_s0 }
  0x19   : > { %p1257_p4 = pnand %p1256_p3, %p1255_p2  ;;  %p1261_p8 = scmp.lt.u32.totalorder %s1259_s16, %s1254_s8 }
  0x1a   : > { %p1263_p9 = scmp.lt.u32.totalorder %s1254_s8, %s1491_s20 }
  0x1b   : > { %p1258_p7 = pneg %p1257_p4  ;;  %p1262_p10 = por %p1261_p8, %p1260_p5 }
  0x1d   : > { %p1264_p0 = por %p1263_p9, %p1262_p10 }
  0x1f   : > { %p1265_p1 = pnand %p1264_p0, %p1258_p7 }
  0x21   : > { %1268 = shalt.err (!%p1265_p1)
}
  0x22   : > { %s1269_s15 = scalar_lea.vmem %s1499_s22, 256  ;;  %s1384_s19 = smov [#allocation2]  }
  0x23   : > { %p1270_p2 = scmp.ne.s32.totalorder %s1499_s22, %s1269_s15  ;;  %s1274_s21 = sshll.u32 %s1384_s19, 4  ;;  %s1275_s21 = int_to_ptr.vmem [resolvable:$false] %s1274_s21 }
  0x24   : > { %s1276_s9 = scalar_lea.vmem %s1275_s21, 512  ;;  %p1277_p11 = scmp.lt.s32.totalorder %s1499_s22, %s1275_s21 }
  0x25   : > { %p1272_p4 = pnand %p1270_p2, %p1256_p3  ;;  %p1278_p5 = scmp.lt.s32.totalorder %s1276_s9, %s1269_s15 }
  0x27   : > { %p1273_p12 = pneg %p1272_p4  ;;  %p1279_p8 = por %p1278_p5, %p1277_p11 }
  0x29   : > { %p1280_p9 = pnand %p1279_p8, %p1273_p12 }
  0x2b   : > { %1283 = shalt.err (!%p1280_p9)
}
  0x2c   : > { %1172 = dma.hbm_to_vmem [thread:$0]  (!%p1495_p13), %s1491_s20, 256, %s1499_s22, %s244_s29  }
  0x2d   : > { %p1704_p0 = scmp.lt.s32.totalorder %s1382_s27, 3  ;;  %p1705_p1 = scmp.ge.s32.totalorder %s1382_s27, 1 }
  0x2f   : > { %p261_p3 = pnand %p1705_p1, %p1704_p0 }
  0x30   : > { %s1533_s8 = sand.u32 (!%p261_p3), 1, %s1374_s25  }
  0x31   : > { %264 = sbr.rel (%p261_p3) target bundleno = 2979 (0xba3), region = 44  ;;  %s1139_s11 = sshll.u32 (!%p261_p3), %s1533_s8, 4 }
  0x32   : > { %s267_s16 = scalar_lea.sflag (!%p261_p3), [#allocation3], %s1533_s8  ;;  %s270_s23 = scalar_lea.vmem (!%p261_p3), [#allocation2], %s1139_s11 }
  0x38   : > { %1357 = dma.done.wait (%p1471_p6), %s267_s16, 256  }
  0x39   : > { %1359 = vsyncadd (%p1471_p6), %s267_s16, 4294967040  ;;  %v1385_v0 = vmov 0   ;;  %v1546_v1 = vld [vmem:[%s270_s23 + $0x8] sm:$0xff]  ;;  %vm325_vm0 = vcmask 1043456   ;;  %v1548_v2 = vld [vmem:[%s270_s23] sm:$0xff]  ;;  %vm321_vm1 = vcmask 64512  }
  0x3a   : > { %364 = vmatprep.mubr.bf16.mxu0 %v1385_v0  ;;  %1216 = vset.pattern.permute.xlu0 %v1385_v0  ;;  %v315_v3 = vpack.c.bf16 %v1546_v1, %v1546_v1  ;;  %v314_v4 = vpack.c.bf16 %v1548_v2, %v1548_v2  ;;  %v309_v5 = vld [vmem:[%s1693_s3] sm:$0xff]  ;;  %s1141_s16 = sshll.u32 %s1533_s8, 3  ;;  %s1158_s12 = sshll.u32 %s1449_s28, 7 }
  0x3b   : > { %433 = vmatprep.mubr.bf16.mxu1 %v1385_v0  ;;  %318 = vperm.xlu0 %1216, %v309_v5   ;;  %v307_v7 = vld [vmem:[%s1692_s2] sm:$0xf]  ;;  %s305_s23 = scalar_lea.vmem [#allocation6], %s1141_s16  ;;  %s1618_s17 = scalar_lea.hbm %s1697_s7, %s1158_s12 }
  0x3c   : > { %1142 = vmatprep.subr.msk.bf16.mxu0 %vm325_vm0, %v315_v3  ;;  %v327_v6 = vsel %vm325_vm0, %v314_v4, 0  ;;  %v311_v8 = vld [vmem:[%s1691_s1] sm:$0xff]  ;;  %s1030_s20 = sshll.u32 %s305_s23, 4  ;;  %s1003_s18 = scalar_lea.sflag [#allocation7], %s1533_s8  ;;  %s1031_s20 = int_to_ptr.vmem [resolvable:$true] %s1030_s20 }
  0x3d   : > { %333 = vmatpush1.bf16.msra.mxu0 %v327_v6  ;;  %v375_v9 = vpack.c.bf16 %v311_v8, %v311_v8  ;;  %s1284_s15 = scalar_lea.vmem %s1031_s20, 128  ;;  %p1706_p11 = scmp.ne.s32.totalorder %s1701_s13, 0 }
  0x3e   : > { %p1285_p6 = scmp.ne.s32.totalorder %s1031_s20, %s1284_s15  ;;  %s1386_s19 = smov [#allocation6]  }
  0x3f   : > { %s1288_s21 = sshll.u32 %s1386_s19, 4  ;;  %s1289_s21 = int_to_ptr.vmem [resolvable:$false] %s1288_s21 }
  0x40   : > { %1143 = vmatmul.mubr.msk.bf16.vlgmr.msra.gmra.mrb[0].mxu0 %vm321_vm1, %v307_v7  ;;  %p1286_p12 = pnand %p1285_p6, %p1706_p11  ;;  %s1290_s9 = scalar_lea.vmem %s1289_s21, 256 }
  0x41   : > { %p1291_p7 = scmp.lt.s32.totalorder %s1031_s20, %s1289_s21  ;;  %p1292_p10 = scmp.lt.s32.totalorder %s1290_s9, %s1284_s15 }
  0x42   : > { %p1287_p13 = pneg %p1286_p12 }
  0x43   : > { %p1293_p2 = por %p1292_p10, %p1291_p7 }
  0x45   : > { %p1294_p4 = pnand %p1293_p2, %p1287_p13 }
  0x59   : > { %376 = vxpose.xlu0.c.b16.start.end [1/1] (short) (narrow) %v375_v9, 16 }
  0xba   : > { %v319_v10 = vpop.permute.xlu0 %318 }
  0xbf   : > { %v384_v20 = vpop.trf.xlu0 }
 0x113   : > { %v366_v11 = vpop.f32.mrb[0].mxu0 }
 0x114   : > { %v367_v12 = vadd.f32 %v366_v11, %v319_v10  ;;  %v368_v13 = vpop.f32.mrb[1].mxu0 }
 0x115   : > { %v369_v14 = vadd.f32 %v368_v13, %v319_v10  ;;  %v370_v15 = vpop.f32.mrb[2].mxu0 }
 0x116   : > { %v1566_v16 = vpack.c.bf16 %v367_v12, %v367_v12  ;;  %v371_v17 = vpop.f32.mrb[3].mxu0 }
 0x117   : > { %v1568_v18 = vpack.c.bf16 %v369_v14, %v369_v14 }
 0x118   : > { %v1572_v19 = vsel %vm325_vm0, %v1566_v16, 0 }
 0x119   : > { %1144 = vmatprep.subr.msk.bf16.mxu1 %vm325_vm0, %v1568_v18  ;;  %517 = vmatprep.mubr.bf16.mxu0 %v1568_v18 }
 0x11a   : > { %402 = vmatpush1.bf16.msra.mxu1 %v1572_v19 }
 0x11b   : > { %1146 = vmatprep.subr.msk.bf16.mxu1 %vm325_vm0, %v1568_v18 }
 0x11d   : > { %1145 = vmatmul.mubr.msk.bf16.vlgmr.msra.gmra.mrb[0].mxu1 %vm321_vm1, %v384_v20 }
 0x11e   : > { %557 = vmatpush1.bf16.msra.mxu1 %v1572_v19  ;;  %588 = vmatprep.mubr.bf16.mxu1 %v1385_v0 }
 0x11f   : > { %1148 = vmatprep.subr.msk.bf16.mxu1 %vm325_vm0, %v1568_v18 }
 0x1f0   : > { %v435_v21 = vpop.f32.mrb[0].mxu1 }
 0x1f1   : > { %v442_v22 = vrot.slane %v435_v21, 4  ;;  %v437_v23 = vpop.f32.mrb[1].mxu1 }
 0x1f2   : > { %v448_v24 = vrot.slane %v437_v23, 4  ;;  %v439_v25 = vpop.f32.mrb[2].mxu1 }
 0x1f3   : > { %v443_v26 = vmax.f32 %v435_v21, %v442_v22  ;;  %v440_v27 = vpop.f32.mrb[3].mxu1 }
 0x1f4   : > { %v449_v28 = vmax.f32 %v437_v23, %v448_v24 }
 0x1f5   : > { %v444_v29 = vrot.slane %v443_v26, 2 }
 0x1f6   : > { %v450_v30 = vrot.slane %v449_v28, 2 }
 0x1f7   : > { %v445_v31 = vmax.f32 %v443_v26, %v444_v29 }
 0x1f8   : > { %v451_v32 = vmax.f32 %v449_v28, %v450_v30 }
 0x1f9   : > { %v446_v33 = vrot.slane %v445_v31, 1 }
 0x1fa   : > { %v452_v34 = vrot.slane %v451_v32, 1 }
 0x1fb   : > { %v447_v35 = vmax.f32 %v445_v31, %v446_v33 }
 0x1fc   : > { %v453_v36 = vmax.f32 %v451_v32, %v452_v34 }
 0x1fd   : > { %v454_v37 = vsub.f32 %v435_v21, %v447_v35 }
 0x1fe   : > { %v455_v38 = vsub.f32 %v437_v23, %v453_v36 }
 0x1ff   : > { %v456_v39 = vmul.f32 1.442695, %v454_v37 }
 0x200   : > { %v458_v40 = vmul.f32 1.442695, %v455_v38 }
 0x201   : > { %1218 = vpow2.f32 %v456_v39 }
 0x202   : > { %1220 = vpow2.f32 %v458_v40 }
 0x20b   : > { %v1219_v41 = vpop.eup %1218 }
 0x20c   : > { %v1221_v42 = vpop.eup %1220  ;;  %v460_v43 = vrot.slane %v1219_v41, 4 }
 0x20d   : > { %v466_v44 = vrot.slane %v1221_v42, 4 }
 0x20e   : > { %v461_v45 = vadd.f32 %v1219_v41, %v460_v43 }
 0x20f   : > { %v467_v46 = vadd.f32 %v1221_v42, %v466_v44 }
 0x210   : > { %v462_v47 = vrot.slane %v461_v45, 2 }
 0x211   : > { %v468_v48 = vrot.slane %v467_v46, 2 }
 0x212   : > { %v463_v49 = vadd.f32 %v462_v47, %v461_v45 }
 0x213   : > { %v469_v50 = vadd.f32 %v468_v48, %v467_v46 }
 0x214   : > { %v464_v51 = vrot.slane %v463_v49, 1 }
 0x215   : > { %v470_v52 = vrot.slane %v469_v50, 1 }
 0x216   : > { %v465_v53 = vadd.f32 %v464_v51, %v463_v49 }
 0x217   : > { %v471_v54 = vadd.f32 %v470_v52, %v469_v50 }
 0x218   : > { %1222 = vrcp.f32 %v465_v53 }
 0x219   : > { %1224 = vrcp.f32 %v471_v54 }
 0x222   : > { %v1223_v55 = vpop.eup %1222 }
 0x223   : > { %v1225_v56 = vpop.eup %1224  ;;  %v474_v57 = vmul.f32 %v1223_v55, %v1219_v41 }
 0x224   : > { %v475_v58 = vmul.f32 %v1225_v56, %v1221_v42 }
 0x226   : > { %v476_v59 = vadd.f32 %v475_v58, %v474_v57 }
 0x228   : > { %477 = vadd.xlane.f32.xlu1 %v476_v59 }
 0x2b5   : > { %v478_v60 = vpop.xlane.xlu1 %477 }
 0x2b6   : > { %v479_v61 = vadd.f32 1e-06, %v478_v60 }
 0x2b8   : > { %1226 = vrcp.f32 %v479_v61 }
 0x2c2   : > { %v1227_v62 = vpop.eup %1226 }
 0x2c3   : > { %v482_v63 = vmul.f32 %v1227_v62, %v475_v58  ;;  %v481_v3 = vmul.f32 %v1227_v62, %v474_v57 }
 0x2c5   : > { %v484_v4 = vpack.c.bf16 %v482_v63, %v482_v63  ;;  %v483_v5 = vpack.c.bf16 %v481_v3, %v481_v3 }
 0x2c7   : > { %485 = vmatprep.subr.bf16.mxu0 %v484_v4 }
 0x2c8   : > { %486 = vmatpush1.bf16.xpose.msra.mxu0 %v483_v5 }
 0x2cf   : > { %518 = vmatmul.mubr.bf16.vlgmr.msra.gmra.mrb[4].mxu0 %v1566_v16 }
 0x2d0   : > { %672 = vmatprep.mubr.bf16.mxu0 %v1568_v18 }
 0x3a2   : > { %v519_v6 = vpop.f32.mrb[4].mxu0 }
 0x3a3   : > { %v525_v7 = vmul.f32 %v519_v6, %v519_v6  ;;  %v521_v8 = vpop.f32.mrb[5].mxu0 }
 0x3a4   : > { %v522_v9 = vpop.f32.mrb[6].mxu0 }
 0x3a5   : > { %v526_v10 = vsel %vm321_vm1, %v525_v7, 0.0  ;;  %v523_v11 = vpop.f32.mrb[7].mxu0 }
 0x3a6   : > { %v527_v12 = vrot.slane %v526_v10, 4 }
 0x3a8   : > { %v528_v13 = vadd.f32 %v527_v12, %v526_v10 }
 0x3aa   : > { %v529_v14 = vrot.slane %v528_v13, 2 }
 0x3ac   : > { %v530_v15 = vadd.f32 %v529_v14, %v528_v13 }
 0x3ae   : > { %v531_v17 = vrot.slane %v530_v15, 1 }
 0x3b0   : > { %v532_v20 = vadd.f32 %v531_v17, %v530_v15 }
 0x3b2   : > { %v533_v21 = vadd.f32 1e-06, %v532_v20 }
 0x3b4   : > { %1228 = vrsqrt.f32 %v533_v21 }
 0x3be   : > { %v1229_v22 = vpop.eup %1228 }
 0x3bf   : > { %v535_v23 = vmul.f32 %v1229_v22, %v519_v6 }
 0x3c1   : > { %v536_v24 = vpack.c.bf16 %v535_v23, %v535_v23 }
 0x3c3   : > { %537 = vxpose.xlu1.c.b16.start.end [1/1] (short) (narrow) %v536_v24, 16 }
 0x3c7   : > { %1217 = vset.pattern.permute.xlu1 %v1385_v0 }
 0x429   : > { %v545_v25 = vpop.trf.xlu1 }
 0x42a   : > { %1147 = vmatmul.mubr.msk.bf16.vlgmr.msra.gmra.mrb[4].mxu1 %vm321_vm1, %v545_v25 }
 0x42b   : > { %712 = vmatpush1.bf16.msra.mxu1 %v1572_v19  ;;  %743 = vmatprep.mubr.bf16.mxu1 %v1385_v0 }
 0x4fd   : > { %v590_v26 = vpop.f32.mrb[4].mxu1 }
 0x4fe   : > { %v597_v27 = vrot.slane %v590_v26, 4  ;;  %v592_v28 = vpop.f32.mrb[5].mxu1 }
 0x4ff   : > { %v603_v29 = vrot.slane %v592_v28, 4  ;;  %v594_v30 = vpop.f32.mrb[6].mxu1 }
 0x500   : > { %v598_v31 = vmax.f32 %v590_v26, %v597_v27  ;;  %v595_v32 = vpop.f32.mrb[7].mxu1 }
 0x501   : > { %v604_v33 = vmax.f32 %v592_v28, %v603_v29 }
 0x502   : > { %v599_v34 = vrot.slane %v598_v31, 2 }
 0x503   : > { %v605_v35 = vrot.slane %v604_v33, 2 }
 0x504   : > { %v600_v36 = vmax.f32 %v598_v31, %v599_v34 }
 0x505   : > { %v606_v37 = vmax.f32 %v604_v33, %v605_v35 }
 0x506   : > { %v601_v38 = vrot.slane %v600_v36, 1 }
 0x507   : > { %v607_v39 = vrot.slane %v606_v37, 1 }
 0x508   : > { %v602_v40 = vmax.f32 %v600_v36, %v601_v38 }
 0x509   : > { %v608_v41 = vmax.f32 %v606_v37, %v607_v39 }
 0x50a   : > { %v609_v42 = vsub.f32 %v590_v26, %v602_v40 }
 0x50b   : > { %v610_v19 = vsub.f32 %v592_v28, %v608_v41 }
 0x50c   : > { %v611_v43 = vmul.f32 1.442695, %v609_v42 }
 0x50d   : > { %v613_v44 = vmul.f32 1.442695, %v610_v19 }
 0x50e   : > { %1230 = vpow2.f32 %v611_v43 }
 0x50f   : > { %1232 = vpow2.f32 %v613_v44 }
 0x518   : > { %v1231_v45 = vpop.eup %1230 }
 0x519   : > { %v1233_v46 = vpop.eup %1232  ;;  %v615_v47 = vrot.slane %v1231_v45, 4 }
 0x51a   : > { %v621_v48 = vrot.slane %v1233_v46, 4 }
 0x51b   : > { %v616_v49 = vadd.f32 %v1231_v45, %v615_v47 }
 0x51c   : > { %v622_v50 = vadd.f32 %v1233_v46, %v621_v48 }
 0x51d   : > { %v617_v51 = vrot.slane %v616_v49, 2 }
 0x51e   : > { %v623_v52 = vrot.slane %v622_v50, 2 }
 0x51f   : > { %v618_v53 = vadd.f32 %v617_v51, %v616_v49 }
 0x520   : > { %v624_v54 = vadd.f32 %v623_v52, %v622_v50 }
 0x521   : > { %v619_v55 = vrot.slane %v618_v53, 1 }
 0x522   : > { %v625_v56 = vrot.slane %v624_v54, 1 }
 0x523   : > { %v620_v57 = vadd.f32 %v619_v55, %v618_v53 }
 0x524   : > { %v626_v58 = vadd.f32 %v625_v56, %v624_v54 }
 0x525   : > { %1234 = vrcp.f32 %v620_v57 }
 0x526   : > { %1236 = vrcp.f32 %v626_v58 }
 0x52f   : > { %v1235_v59 = vpop.eup %1234 }
 0x530   : > { %v1237_v60 = vpop.eup %1236  ;;  %v629_v61 = vmul.f32 %v1235_v59, %v1231_v45 }
 0x531   : > { %v630_v62 = vmul.f32 %v1237_v60, %v1233_v46 }
 0x533   : > { %v631_v63 = vadd.f32 %v630_v62, %v629_v61 }
 0x535   : > { %632 = vadd.xlane.f32.xlu0 %v631_v63 }
 0x5c2   : > { %v633_v3 = vpop.xlane.xlu0 %632 }
 0x5c3   : > { %v634_v4 = vadd.f32 1e-06, %v633_v3 }
 0x5c5   : > { %1238 = vrcp.f32 %v634_v4 }
 0x5cf   : > { %v1239_v5 = vpop.eup %1238 }
 0x5d0   : > { %v637_v6 = vmul.f32 %v1239_v5, %v630_v62  ;;  %v636_v7 = vmul.f32 %v1239_v5, %v629_v61 }
 0x5d2   : > { %v639_v8 = vpack.c.bf16 %v637_v6, %v637_v6  ;;  %v638_v9 = vpack.c.bf16 %v636_v7, %v636_v7 }
 0x5d4   : > { %640 = vmatprep.subr.bf16.mxu0 %v639_v8 }
 0x5d5   : > { %641 = vmatpush1.bf16.xpose.msra.mxu0 %v638_v9  ;;  %v310_v9 = vld [vmem:[%s1695_s5] sm:$0xff] }
 0x5dc   : > { %673 = vmatmul.mubr.bf16.vlgmr.msra.gmra.mrb[8].mxu0 %v1566_v16 }
 0x5dd   : > { %827 = vmatprep.mubr.bf16.mxu0 %v1568_v18 }
 0x6af   : > { %v674_v10 = vpop.f32.mrb[8].mxu0 }
 0x6b0   : > { %v680_v11 = vmul.f32 %v674_v10, %v674_v10  ;;  %v676_v12 = vpop.f32.mrb[9].mxu0 }
 0x6b1   : > { %v677_v13 = vpop.f32.mrb[10].mxu0 }
 0x6b2   : > { %v681_v14 = vsel %vm321_vm1, %v680_v11, 0.0  ;;  %v678_v15 = vpop.f32.mrb[11].mxu0 }
 0x6b3   : > { %v682_v17 = vrot.slane %v681_v14, 4 }
 0x6b5   : > { %v683_v20 = vadd.f32 %v682_v17, %v681_v14 }
 0x6b7   : > { %v684_v21 = vrot.slane %v683_v20, 2 }
 0x6b9   : > { %v685_v22 = vadd.f32 %v684_v21, %v683_v20 }
 0x6bb   : > { %v686_v23 = vrot.slane %v685_v22, 1 }
 0x6bd   : > { %v687_v24 = vadd.f32 %v686_v23, %v685_v22 }
 0x6bf   : > { %v688_v25 = vadd.f32 1e-06, %v687_v24 }
 0x6c1   : > { %1240 = vrsqrt.f32 %v688_v25 }
 0x6cb   : > { %v1241_v26 = vpop.eup %1240 }
 0x6cc   : > { %v690_v27 = vmul.f32 %v1241_v26, %v674_v10 }
 0x6ce   : > { %v691_v28 = vpack.c.bf16 %v690_v27, %v690_v27 }
 0x6d0   : > { %692 = vxpose.xlu0.c.b16.start.end [1/1] (short) (narrow) %v691_v28, 16 }
 0x736   : > { %v700_v18 = vpop.trf.xlu0 }
 0x737   : > { %1149 = vmatmul.mubr.msk.bf16.vlgmr.msra.gmra.mrb[8].mxu1 %vm321_vm1, %v700_v18 }
 0x738   : > { %890 = vmatprep.mubr.bf16.mxu1 %v1385_v0 }
 0x80a   : > { %v745_v29 = vpop.f32.mrb[8].mxu1 }
 0x80b   : > { %v752_v30 = vrot.slane %v745_v29, 4  ;;  %v747_v31 = vpop.f32.mrb[9].mxu1 }
 0x80c   : > { %v758_v32 = vrot.slane %v747_v31, 4  ;;  %v749_v33 = vpop.f32.mrb[10].mxu1 }
 0x80d   : > { %v753_v34 = vmax.f32 %v745_v29, %v752_v30  ;;  %v750_v35 = vpop.f32.mrb[11].mxu1 }
 0x80e   : > { %v759_v36 = vmax.f32 %v747_v31, %v758_v32 }
 0x80f   : > { %v754_v37 = vrot.slane %v753_v34, 2 }
 0x810   : > { %v760_v38 = vrot.slane %v759_v36, 2 }
 0x811   : > { %v755_v39 = vmax.f32 %v753_v34, %v754_v37 }
 0x812   : > { %v761_v40 = vmax.f32 %v759_v36, %v760_v38 }
 0x813   : > { %v756_v41 = vrot.slane %v755_v39, 1 }
 0x814   : > { %v762_v42 = vrot.slane %v761_v40, 1 }
 0x815   : > { %v757_v19 = vmax.f32 %v755_v39, %v756_v41 }
 0x816   : > { %v763_v43 = vmax.f32 %v761_v40, %v762_v42  ;;  %v308_v42 = vld [vmem:[%s1694_s4] sm:$0xf] }
 0x817   : > { %v764_v44 = vsub.f32 %v745_v29, %v757_v19 }
 0x818   : > { %v765_v45 = vsub.f32 %v747_v31, %v763_v43 }
 0x819   : > { %v766_v46 = vmul.f32 1.442695, %v764_v44 }
 0x81a   : > { %v768_v47 = vmul.f32 1.442695, %v765_v45 }
 0x81b   : > { %1242 = vpow2.f32 %v766_v46 }
 0x81c   : > { %1244 = vpow2.f32 %v768_v47 }
 0x825   : > { %v1243_v48 = vpop.eup %1242 }
 0x826   : > { %v1245_v49 = vpop.eup %1244  ;;  %v770_v50 = vrot.slane %v1243_v48, 4 }
 0x827   : > { %v776_v51 = vrot.slane %v1245_v49, 4 }
 0x828   : > { %v771_v52 = vadd.f32 %v1243_v48, %v770_v50 }
 0x829   : > { %v777_v53 = vadd.f32 %v1245_v49, %v776_v51 }
 0x82a   : > { %v772_v54 = vrot.slane %v771_v52, 2 }
 0x82b   : > { %v778_v55 = vrot.slane %v777_v53, 2 }
 0x82c   : > { %v773_v56 = vadd.f32 %v772_v54, %v771_v52 }
 0x82d   : > { %v779_v57 = vadd.f32 %v778_v55, %v777_v53 }
 0x82e   : > { %v774_v58 = vrot.slane %v773_v56, 1 }
 0x82f   : > { %v780_v59 = vrot.slane %v779_v57, 1 }
 0x830   : > { %v775_v60 = vadd.f32 %v774_v58, %v773_v56 }
 0x831   : > { %v781_v61 = vadd.f32 %v780_v59, %v779_v57 }
 0x832   : > { %1246 = vrcp.f32 %v775_v60 }
 0x833   : > { %1248 = vrcp.f32 %v781_v61 }
 0x83c   : > { %v1247_v62 = vpop.eup %1246 }
 0x83d   : > { %v1249_v63 = vpop.eup %1248  ;;  %v784_v3 = vmul.f32 %v1247_v62, %v1243_v48 }
 0x83e   : > { %v785_v4 = vmul.f32 %v1249_v63, %v1245_v49 }
 0x83f   : > { %v847_v5 = vpack.c.bf16 %v784_v3, %v784_v3 }
 0x840   : > { %v848_v6 = vpack.c.bf16 %v785_v4, %v785_v4  ;;  %v786_v7 = vadd.f32 %v785_v4, %v784_v3 }
 0x841   : > { %v853_v8 = vsel %vm325_vm0, %v847_v5, 0 }
 0x842   : > { %1150 = vmatprep.subr.msk.bf16.mxu1 %vm325_vm0, %v848_v6  ;;  %787 = vadd.xlane.f32.xlu1 %v786_v7 }
 0x843   : > { %859 = vmatpush1.bf16.msra.mxu1 %v853_v8 }
 0x853   : > { %905 = vperm.xlu1 %1217, %v310_v9  }
 0x8cf   : > { %v788_v10 = vpop.xlane.xlu1 %787 }
 0x8d0   : > { %v789_v11 = vadd.f32 1e-06, %v788_v10 }
 0x8d2   : > { %1250 = vrcp.f32 %v789_v11 }
 0x8d3   : > { %v906_v19 = vpop.permute.xlu1 %905 }
 0x8dc   : > { %v1251_v12 = vpop.eup %1250 }
 0x8dd   : > { %v792_v13 = vmul.f32 %v1251_v12, %v785_v4  ;;  %v791_v14 = vmul.f32 %v1251_v12, %v784_v3 }
 0x8df   : > { %v794_v15 = vpack.c.bf16 %v792_v13, %v792_v13  ;;  %v793_v17 = vpack.c.bf16 %v791_v14, %v791_v14 }
 0x8e1   : > { %795 = vmatprep.subr.bf16.mxu0 %v794_v15 }
 0x8e2   : > { %796 = vmatpush1.bf16.xpose.msra.mxu0 %v793_v17 }
 0x8e9   : > { %828 = vmatmul.mubr.bf16.vlgmr.msra.gmra.mrb[12].mxu0 %v1566_v16 }
 0x8ea   : > { %949 = vmatprep.mubr.bf16.mxu0 %v1385_v0 }
 0x9bc   : > { %v829_v20 = vpop.f32.mrb[12].mxu0 }
 0x9bd   : > { %v835_v21 = vmul.f32 %v829_v20, %v829_v20  ;;  %v831_v22 = vpop.f32.mrb[13].mxu0 }
 0x9be   : > { %v832_v23 = vpop.f32.mrb[14].mxu0 }
 0x9bf   : > { %v836_v24 = vsel %vm321_vm1, %v835_v21, 0.0  ;;  %v833_v25 = vpop.f32.mrb[15].mxu0 }
 0x9c0   : > { %v837_v26 = vrot.slane %v836_v24, 4 }
 0x9c2   : > { %v838_v27 = vadd.f32 %v837_v26, %v836_v24 }
 0x9c4   : > { %v839_v28 = vrot.slane %v838_v27, 2 }
 0x9c6   : > { %v840_v18 = vadd.f32 %v839_v28, %v838_v27 }
 0x9c8   : > { %v841_v29 = vrot.slane %v840_v18, 1 }
 0x9ca   : > { %v842_v30 = vadd.f32 %v841_v29, %v840_v18 }
 0x9cc   : > { %v843_v31 = vadd.f32 1e-06, %v842_v30 }
 0x9ce   : > { %1252 = vrsqrt.f32 %v843_v31 }
 0x9d8   : > { %v1253_v32 = vpop.eup %1252 }
 0x9d9   : > { %v845_v33 = vmul.f32 %v1253_v32, %v829_v20 }
 0x9db   : > { %v846_v16 = vpack.c.bf16 %v845_v33, %v845_v33  ;;  %964 = vxpose.xlu1.b32.start.end [1/1] (short) (narrow) %v845_v33, 8 }
 0x9dd   : > { %1151 = vmatmul.mubr.msk.bf16.vlgmr.msra.gmra.mrb[12].mxu1 %vm321_vm1, %v846_v16 }
 0xa5b   : > { %v980_v43 = vpop.trf.xlu1 }
 0xa5c   : > { %996 = vst.msk [vmem:[%s305_s23] sm:$0xff] %vm321_vm1, %v980_v43 }
 0xab0   : > { %v892_v0 = vpop.f32.mrb[12].mxu1 }
 0xab1   : > { %v899_v34 = vmax.f32 %v892_v0, 0.0  ;;  %v894_v35 = vpop.f32.mrb[13].mxu1 }
 0xab2   : > { %v900_v36 = vmax.f32 %v894_v35, 0.0  ;;  %v896_v37 = vpop.f32.mrb[14].mxu1 }
 0xab3   : > { %v901_v38 = vpack.c.bf16 %v899_v34, %v899_v34  ;;  %v897_v39 = vpop.f32.mrb[15].mxu1 }
 0xab4   : > { %v902_v40 = vpack.c.bf16 %v900_v36, %v900_v36 }
 0xab5   : > { %v912_v41 = vsel %vm325_vm0, %v901_v38, 0 }
 0xab6   : > { %1152 = vmatprep.subr.msk.bf16.mxu0 %vm325_vm0, %v902_v40 }
 0xab7   : > { %918 = vmatpush1.bf16.msra.mxu0 %v912_v41 }
 0xaba   : > { %1153 = vmatmul.mubr.msk.bf16.vlgmr.msra.gmra.mrb[16].mxu0 %vm321_vm1, %v308_v42 }
 0xabb   : > { %1297 = shalt.err (!%p1294_p4)
}
 0xabc   : > { %s1298_s16 = scalar_lea.hbm %s1618_s17, 128  ;;  %s1302_s22 = scalar_lea.hbm %s1697_s7, 256 }
 0xabd   : > { %p1299_p5 = scmp.ne.s32.totalorder %s1618_s17, %s1298_s16  ;;  %p1303_p0 = scmp.lt.u32.totalorder %s1618_s17, %s1697_s7 }
 0xabe   : > { %p1304_p1 = scmp.lt.u32.totalorder %s1302_s22, %s1298_s16  ;;  %p1306_p6 = scmp.lt.u32.totalorder %s1298_s16, %s1618_s17 }
 0xabf   : > { %p1300_p8 = pnand %p1299_p5, %p1706_p11 }
 0xac0   : > { %p1305_p3 = por %p1304_p1, %p1303_p0 }
 0xac1   : > { %p1301_p9 = pneg %p1300_p8 }
 0xac2   : > { %p1307_p12 = por %p1306_p6, %p1305_p3 }
 0xac4   : > { %p1308_p13 = pnand %p1307_p12, %p1301_p9 }
 0xac6   : > { %1311 = shalt.err (!%p1308_p13)
}
 0xac7   : > { %1166 = dma.vmem_to_hbm [thread:$0]  (%p1706_p11), %s1031_s20, 128, %s1618_s17, %s1003_s18  }
 0xac8   : > { %s1162_s15 = sshll.u32 %s1449_s28, 8  ;;  %s298_s21 = scalar_lea.vmem [#allocation5], %s1139_s11 }
 0xac9   : > { %s1017_s9 = sshll.u32 %s298_s21, 4  ;;  %s1646_s17 = scalar_lea.hbm %s1696_s6, %s1162_s15  ;;  %s1648_s9 = int_to_ptr.vmem [resolvable:$true] %s1017_s9 }
 0xaca   : > { %s998_s28 = scalar_lea.sflag [#allocation4], %s1533_s8  ;;  %s1312_s18 = scalar_lea.vmem %s1648_s9, 256 }
 0xacb   : > { %p1313_p7 = scmp.ne.s32.totalorder %s1648_s9, %s1312_s18  ;;  %s1387_s11 = smov [#allocation5]  }
 0xacc   : > { %s1316_s23 = sshll.u32 %s1387_s11, 4  ;;  %s1317_s23 = int_to_ptr.vmem [resolvable:$false] %s1316_s23 }
 0xacd   : > { %p1314_p10 = pnand %p1313_p7, %p1706_p11  ;;  %s1318_s12 = scalar_lea.vmem %s1317_s23, 512 }
 0xace   : > { %p1319_p4 = scmp.lt.s32.totalorder %s1648_s9, %s1317_s23  ;;  %p1320_p5 = scmp.lt.s32.totalorder %s1318_s12, %s1312_s18 }
 0xacf   : > { %p1315_p2 = pneg %p1314_p10 }
 0xad0   : > { %p1321_p8 = por %p1320_p5, %p1319_p4 }
 0xad2   : > { %p1322_p9 = pnand %p1321_p8, %p1315_p2 }
 0xb8d   : > { %v951_v44 = vpop.f32.mrb[16].mxu0 }
 0xb8e   : > { %v952_v45 = vadd.f32 %v951_v44, %v906_v19  ;;  %v953_v46 = vpop.f32.mrb[17].mxu0 }
 0xb8f   : > { %v954_v47 = vadd.f32 %v953_v46, %v906_v19  ;;  %v955_v48 = vpop.f32.mrb[18].mxu0 }
 0xb90   : > { %v958_v49 = vadd.f32 %v952_v45, %v1548_v2  ;;  %v956_v50 = vpop.f32.mrb[19].mxu0 }
 0xb91   : > { %v959_v51 = vadd.f32 %v954_v47, %v1546_v1 }
 0xb92   : > { %v960_v52 = vmax.f32 %v958_v49, 0.0 }
 0xb93   : > { %v961_v53 = vmax.f32 %v959_v51, 0.0 }
 0xb94   : > { %962 = vst [vmem:[%s298_s21] sm:$0xff] %v960_v52 }
 0xb95   : > { %963 = vst [vmem:[%s298_s21 + $0x8] sm:$0xff] %v961_v53 }
 0xb96   : > { %1325 = shalt.err (!%p1322_p9)
}
 0xb97   : > { %s1326_s8 = scalar_lea.hbm %s1646_s17, 256  ;;  %s1330_s19 = scalar_lea.hbm %s1696_s6, 512 }
 0xb98   : > { %p1327_p0 = scmp.ne.s32.totalorder %s1646_s17, %s1326_s8  ;;  %p1331_p6 = scmp.lt.u32.totalorder %s1646_s17, %s1696_s6 }
 0xb99   : > { %p1332_p12 = scmp.lt.u32.totalorder %s1330_s19, %s1326_s8  ;;  %p1334_p7 = scmp.lt.u32.totalorder %s1326_s8, %s1646_s17 }
 0xb9a   : > { %p1328_p1 = pnand %p1327_p0, %p1706_p11 }
 0xb9b   : > { %p1333_p13 = por %p1332_p12, %p1331_p6 }
 0xb9c   : > { %p1329_p3 = pneg %p1328_p1 }
 0xb9d   : > { %p1335_p10 = por %p1334_p7, %p1333_p13 }
 0xb9f   : > { %p1336_p2 = pnand %p1335_p10, %p1329_p3 }
 0xba1   : > { %1339 = shalt.err (!%p1336_p2)
}
 0xba2   : > { %1165 = dma.vmem_to_hbm [thread:$0]  (%p1706_p11), %s1648_s9, 256, %s1646_s17, %s998_s28  }
 0xba3 PF: > { %s1042_s16 = sand.u32 1, %s1370_s24   ;;  %p1707_p4 = scmp.ne.s32.totalorder %s1702_s14, 0 }
 0xba4   : > { %p1708_p5 = scmp.ge.s32.totalorder %s1382_s27, 2  ;;  %s1043_s20 = scalar_lea.sflag [#allocation4], %s1042_s16 }
 0xba6   : > { %p1174_p8 = pnand %p1708_p5, %p1707_p4 }
 0xba8   : > { %1361 = dma.done.wait (!%p1174_p8), %s1043_s20, 256  }
 0xba9   : > { %1363 = vsyncadd (!%p1174_p8), %s1043_s20, 4294967040  ;;  %s1052_s18 = scalar_lea.sflag [#allocation7], %s1042_s16 }
 0xbaa   : > { %1365 = dma.done.wait (!%p1174_p8), %s1052_s18, 128  }
 0xbab   : > { %1367 = vsyncadd (!%p1174_p8), %s1052_s18, 4294967168  ;;  %p24_p11 = scmp.ge.s32.totalorder %s1453_s30, 4   ;;  %s1709_s24 = smov %s1374_s25 }
 0xbac   : > { %s1710_s25 = smov %s1378_s26  ;;  %s1711_s26 = smov %s1465_s10 }
 0xbad   : > { %s1712_s27 = smov %s1453_s30  ;;  %26 = sbr.rel (!%p24_p11) target bundleno = 7 (0x7), region = 106 }
 0xbb4   :  { %1057 = vsyncpa [#allocation3], 1 }
 0xbb5   :  { %1059 = vsyncpa [#allocation3 + $0x1], 1 }
 0xbb6   :  { %1060 = vsyncpa [#allocation4], 1 }
 0xbb7   :  { %1062 = vsyncpa [#allocation4 + $0x1], 1 }
 0xbb8   :  { %1063 = vsyncpa [#allocation7], 1 }
 0xbb9   :  { %1065 = vsyncpa [#allocation7 + $0x1], 1 }

</bundles_post_ra>
